<compile_context>
chip_gen: v5e
topology: v5e:2x2
jax: 0.10.0
libtpu: 0.0.40
codegen_flags: <defaults>
</compile_context>

<pallas_src>
import functools

import jax
import jax.numpy as jnp
from jax import lax
from jax.experimental import pallas as pl
from jax.experimental.pallas import tpu as pltpu

_LANES = 128
# Row-tile cap; the VMEM budget below limits f32 to 2048 rows and bf16 to 4096
# rows (~1 MiB per block either way; 2 inputs x 2 pipeline buffers = 4 MiB).
_MAX_TILE_ROWS = 4096


def _round_up(a: int, b: int) -> int:
    return -(-a // b) * b


def _int_pow(x, e: int):
    """x**e for a small static non-negative integer e (VPU multiplies only)."""
    if e == 0:
        return jnp.ones_like(x)
    result = None
    base = x
    while e:
        if e & 1:
            result = base if result is None else result * base
        e >>= 1
        if e:
            base = base * base
    return result


def _focal_loss_kernel(alpha_ref, x_ref, t_ref, psum_ref, *,
                       gamma, has_alpha, soft_targets, need_mask,
                       n_valid, tile_rows):
    x = x_ref[...].astype(jnp.float32)
    t = t_ref[...].astype(jnp.float32)

    # Numerically-stable BCE-with-logits (matches torch's formulation):
    #   bce = max(x, 0) - x*t + log(1 + exp(-|x|))
    s = jnp.exp(-jnp.abs(x))            # shared with the hard-target pt path
    bce = jnp.maximum(x, 0.0) - x * t + jnp.log1p(s)

    if soft_targets:
        # Exact general form (arbitrary float targets), as in the PyTorch code.
        pt = jnp.exp(-bce)
    else:
        # Hard {0,1} targets: pt = sigmoid(x) if t==1 else sigmoid(-x)
        #   = where(prediction sign agrees with t, 1, s) / (1 + s)
        # Reuses s, dropping one exp/element from the single EUP slot.  The
        # approx reciprocal is refined with one Newton step (2 VPU ops) to
        # keep ~f32 accuracy vs the exp(-bce) formulation.
        one_plus_s = 1.0 + s
        r = pl.reciprocal(one_plus_s, approx=True)
        r = r * (2.0 - one_plus_s * r)
        agree = (x >= 0.0) == (t > 0.5)
        pt = jnp.where(agree, 1.0, s) * r

    one_minus_pt = 1.0 - pt

    # Specialize the focal weight for integer gamma (e.g. gamma=2) to avoid a
    # pow (= log + exp) on the already-busy EUP slot.
    if float(gamma).is_integer() and 0 <= int(gamma) <= 16:
        w = _int_pow(one_minus_pt, int(gamma))
    else:
        # Clamp: f32 rounding can leave pt marginally > 1, and
        # pow(negative, non-integer) would be NaN.
        w = jnp.power(jnp.maximum(one_minus_pt, 0.0), gamma)
    focal = w * bce

    if has_alpha:
        a0 = alpha_ref[0]
        da = alpha_ref[1] - alpha_ref[0]          # scalar-unit subtract, once
        focal = (a0 + da * t) * focal             # 2 VPU ops to form alpha_t

    def _partial_sum(v):
        # Lane-wide partial sums for this tile: pure vreg adds (no cross-lane
        # reduce, no carried scalar).  Final reduce happens once, outside.
        return jnp.sum(v.reshape(-1, 8, _LANES), axis=0)

    if need_mask:
        tile_elems = tile_rows * _LANES
        # Elements still valid at the start of this tile; avoids the global
        # flat-index multiply that could overflow int32 for huge inputs.
        rem = n_valid - pl.program_id(0) * tile_elems

        @pl.when(rem >= tile_elems)               # fully-valid tiles: no mask
        def _():
            psum_ref[...] = _partial_sum(focal)

        @pl.when(rem < tile_elems)                # only the ragged tail tile
        def _():
            rows = lax.broadcasted_iota(jnp.int32, focal.shape, 0)
            lanes = lax.broadcasted_iota(jnp.int32, focal.shape, 1)
            local = rows * _LANES + lanes
            psum_ref[...] = _partial_sum(jnp.where(local < rem, focal, 0.0))
    else:
        psum_ref[...] = _partial_sum(focal)


def focal_loss(inputs, targets, *, alpha=None, gamma=2.0, reduction="mean",
               soft_targets=False):
    """Pallas TPU implementation of FocalLoss.forward (any input shape).

    soft_targets=False (default) assumes hard 0/1 targets (the module's use
    case) and takes a cheaper pt path; set soft_targets=True for arbitrary
    float targets to reproduce the exp(-bce) formulation exactly.
    """
    assert inputs.shape == targets.shape
    n = int(inputs.size)
    assert n > 0

    x = inputs.reshape(-1)
    t = targets.reshape(-1)
    if not jnp.issubdtype(x.dtype, jnp.floating):
        x = x.astype(jnp.float32)
    if not jnp.issubdtype(t.dtype, jnp.floating):
        t = t.astype(jnp.float32)

    # Lane-dense (rows, 128) slab.  Aligned sizes (n % 1024 == 0) reshape with
    # no copy; ragged sizes get a single tiny tail pad to the next (8, 128)
    # boundary (zeros, removed by the in-kernel mask).
    n_slab = _round_up(n, 8 * _LANES)
    if n_slab != n:
        x = jnp.pad(x, (0, n_slab - n))
        t = jnp.pad(t, (0, n_slab - n))
    rows = n_slab // _LANES
    x2 = x.reshape(rows, _LANES)
    t2 = t.reshape(rows, _LANES)

    # Tile sizing: biggest row tile keeping the double-buffered (x, t) block
    # pair within ~4 MiB -> 2048 rows f32 / 4096 rows bf16 (~1 MiB per block),
    # the ~85%-of-HBM-roofline regime, far under every generation's scoped
    # VMEM limit.
    bytes_per_row = _LANES * (x2.dtype.itemsize + t2.dtype.itemsize)
    budget_rows = max(8, ((4 * 1024 * 1024) // (2 * bytes_per_row)) // 8 * 8)
    cap = min(_MAX_TILE_ROWS, budget_rows)

    # Balanced tiling: pick the tile count first, then the smallest 8-row-
    # aligned tile that covers the input.  Per-tile padding stays < 8 rows and
    # no padded copy is ever streamed from HBM (the grid's last block may run
    # past the slab; Pallas clips the DMA, the kernel masks the math).
    num_tiles = -(-rows // cap)
    if num_tiles == 1 and rows > 8:
        num_tiles = 2            # >= 2 grid steps so v7x can use both TCs
    if 1 < num_tiles <= 8 and num_tiles % 2:
        num_tiles += 1           # even step count -> balanced megacore split
    tile_rows = _round_up(-(-rows // num_tiles), 8)
    covered = num_tiles * tile_rows * _LANES
    need_mask = covered != n
    if covered >= 2**31:
        raise ValueError("focal_loss: input too large for int32 tile indexing")

    has_alpha = alpha is not None
    alpha_arr = (jnp.asarray(alpha, jnp.float32).reshape(2) if has_alpha
                 else jnp.ones((2,), jnp.float32))

    kernel = functools.partial(
        _focal_loss_kernel, gamma=float(gamma), has_alpha=has_alpha,
        soft_targets=bool(soft_targets), need_mask=need_mask,
        n_valid=n, tile_rows=tile_rows)

    partial_sums = pl.pallas_call(
        kernel,
        out_shape=jax.ShapeDtypeStruct((num_tiles * 8, _LANES), jnp.float32),
        grid_spec=pltpu.PrefetchScalarGridSpec(
            num_scalar_prefetch=0,
            grid=(num_tiles,),
            in_specs=[
                pl.BlockSpec(memory_space=pltpu.SMEM),                  # alpha (2,)
                pl.BlockSpec((tile_rows, _LANES), lambda i: (i, 0)),    # logits
                pl.BlockSpec((tile_rows, _LANES), lambda i: (i, 0)),    # targets
            ],
            out_specs=pl.BlockSpec((8, _LANES), lambda i: (i, 0)),      # partials
        ),
        compiler_params=pltpu.CompilerParams(
            # Independent per-tile partial sums: fully parallel grid (lets v7x
            # shard across both TensorCores); harmless on v5e/v6e.
            dimension_semantics=("parallel",),
            vmem_limit_bytes=32 * 1024 * 1024,
        ),
    )(alpha_arr, x2, t2)

    total = jnp.sum(partial_sums)
    if reduction == "mean":
        return total / jnp.float32(n)
    return total


def _focal_loss_ref(inputs, targets, alpha=None, gamma=2.0, reduction="mean"):
    """Pure-JAX reference mirroring the PyTorch module."""
    x = inputs.astype(jnp.float32)
    t = targets.astype(jnp.float32)
    bce = jnp.maximum(x, 0.0) - x * t + jnp.log1p(jnp.exp(-jnp.abs(x)))
    pt = jnp.exp(-bce)
    focal = (1.0 - pt) ** gamma * bce
    if alpha is not None:
        a = jnp.asarray(alpha, jnp.float32)
        focal = (a[0] * (1.0 - t) + a[1] * t) * focal
    return focal.mean() if reduction == "mean" else focal.sum()


if __name__ == "__main__":
    key = jax.random.PRNGKey(0)
    k1, k2, k3, k4, k5, k6 = jax.random.split(key, 6)

    alpha = jnp.array([0.25, 0.75], dtype=jnp.float32)

    # Case 1: aligned NCHW-like slab (no padding, 2 parallel tiles), alpha,
    # mean reduction, hard-target fast path.
    x1 = jax.random.normal(k1, (2, 4, 16, 16), dtype=jnp.float32)
    t1 = jax.random.bernoulli(k2, 0.3, (2, 4, 16, 16)).astype(jnp.float32)
    out1 = focal_loss(x1, t1, alpha=alpha, gamma=2.0, reduction="mean")
    jax.block_until_ready(out1)
    ref1 = _focal_loss_ref(x1, t1, alpha=alpha, gamma=2.0, reduction="mean")
    assert jnp.allclose(out1, ref1, rtol=1e-3, atol=1e-6), (out1, ref1)

    # Case 2: ragged size (tiny tail pad + in-kernel mask), no alpha,
    # non-integer gamma (pow fallback + clamp), sum reduction.
    x2 = jax.random.normal(k3, (3, 5, 7), dtype=jnp.float32)
    t2 = jax.random.bernoulli(k4, 0.5, (3, 5, 7)).astype(jnp.float32)
    out2 = focal_loss(x2, t2, alpha=None, gamma=1.5, reduction="sum")
    jax.block_until_ready(out2)
    ref2 = _focal_loss_ref(x2, t2, alpha=None, gamma=1.5, reduction="sum")
    assert jnp.allclose(out2, ref2, rtol=1e-3, atol=1e-4), (out2, ref2)

    # Case 3: bf16 inputs/targets end-to-end (halved HBM traffic, 4096-row cap).
    out3 = focal_loss(x1.astype(jnp.bfloat16), t1.astype(jnp.bfloat16),
                      alpha=alpha, gamma=2.0, reduction="mean")
    jax.block_until_ready(out3)
    ref3 = _focal_loss_ref(x1.astype(jnp.bfloat16), t1.astype(jnp.bfloat16),
                           alpha=alpha, gamma=2.0, reduction="mean")
    assert jnp.allclose(out3, ref3, rtol=1e-3, atol=1e-6), (out3, ref3)

    # Case 4: soft targets (exact exp(-bce) path) on a slab whose last grid
    # block is ragged (Pallas clips the DMA; in-kernel mask zeroes the rest).
    x4 = jax.random.normal(k5, (3, 3, 32, 32), dtype=jnp.float32)
    t4 = jax.random.uniform(k6, (3, 3, 32, 32), dtype=jnp.float32)
    out4 = focal_loss(x4, t4, alpha=alpha, gamma=2.0, reduction="mean",
                      soft_targets=True)
    jax.block_until_ready(out4)
    ref4 = _focal_loss_ref(x4, t4, alpha=alpha, gamma=2.0, reduction="mean")
    assert jnp.allclose(out4, ref4, rtol=1e-4, atol=1e-6), (out4, ref4)

    print("KERNEL_OK")
</pallas_src>

<mosaic_0001>
module attributes {stable_mosaic.version = 11 : i64} {
  func.func @_focal_loss_kernel(%arg0: i32, %arg1: memref<2xf32, #tpu.memory_space<smem>>, %arg2: memref<8x128xf32, #tpu.memory_space<vmem>>, %arg3: memref<8x128xf32, #tpu.memory_space<vmem>>, %arg4: memref<8x128xf32, #tpu.memory_space<vmem>>) attributes {dimension_semantics = [#tpu.dimension_semantics<parallel>], iteration_bounds = array<i64: 2>, scalar_prefetch = 0 : i64, scratch_operands = 0 : i64, tpu.core_type = #tpu.core_type<tc>, window_params = [{transform_indices = @transform_0, window_bounds = array<i64: 2>}, {transform_indices = @transform_1, window_bounds = array<i64: 8, 128>}, {transform_indices = @transform_2, window_bounds = array<i64: 8, 128>}, {transform_indices = @transform_3, window_bounds = array<i64: 8, 128>}]} {
    %c0 = arith.constant 0 : index
    %c0_0 = arith.constant 0 : index
    %0 = vector.load %arg2[%c0, %c0_0] : memref<8x128xf32, #tpu.memory_space<vmem>>, vector<8x128xf32>
    %c0_1 = arith.constant 0 : index
    %c0_2 = arith.constant 0 : index
    %1 = vector.load %arg3[%c0_1, %c0_2] : memref<8x128xf32, #tpu.memory_space<vmem>>, vector<8x128xf32>
    %2 = math.absf %0 : vector<8x128xf32>
    %cst = arith.constant 0.000000e+00 : f32
    %3 = vector.broadcast %cst : f32 to vector<8x128xf32>
    %4 = arith.subf %3, %2 : vector<8x128xf32>
    %5 = math.exp %4 : vector<8x128xf32>
    %cst_3 = arith.constant 0.000000e+00 : f32
    %6 = vector.broadcast %cst_3 : f32 to vector<8x128xf32>
    %7 = arith.maximumf %0, %6 : vector<8x128xf32>
    %8 = arith.mulf %0, %1 : vector<8x128xf32>
    %9 = arith.subf %7, %8 : vector<8x128xf32>
    %10 = math.log1p %5 : vector<8x128xf32>
    %11 = arith.addf %9, %10 : vector<8x128xf32>
    %cst_4 = arith.constant 1.000000e+00 : f32
    %12 = vector.broadcast %cst_4 : f32 to vector<8x128xf32>
    %13 = arith.addf %12, %5 : vector<8x128xf32>
    %14 = tpu.reciprocal %13 {approx = true} : vector<8x128xf32> -> vector<8x128xf32>
    %15 = arith.mulf %13, %14 : vector<8x128xf32>
    %cst_5 = arith.constant 2.000000e+00 : f32
    %16 = vector.broadcast %cst_5 : f32 to vector<8x128xf32>
    %17 = arith.subf %16, %15 : vector<8x128xf32>
    %18 = arith.mulf %14, %17 : vector<8x128xf32>
    %cst_6 = arith.constant 0.000000e+00 : f32
    %19 = vector.broadcast %cst_6 : f32 to vector<8x128xf32>
    %20 = arith.cmpf oge, %0, %19 : vector<8x128xf32>
    %cst_7 = arith.constant 5.000000e-01 : f32
    %21 = vector.broadcast %cst_7 : f32 to vector<8x128xf32>
    %22 = arith.cmpf ogt, %1, %21 : vector<8x128xf32>
    %23 = arith.xori %20, %22 : vector<8x128xi1>
    %cst_8 = arith.constant dense<true> : vector<8x128xi1>
    %24 = arith.xori %23, %cst_8 : vector<8x128xi1>
    %cst_9 = arith.constant 1.000000e+00 : f32
    %25 = vector.broadcast %cst_9 : f32 to vector<8x128xf32>
    %26 = arith.select %24, %25, %5 : vector<8x128xi1>, vector<8x128xf32>
    %27 = arith.mulf %26, %18 : vector<8x128xf32>
    %cst_10 = arith.constant 1.000000e+00 : f32
    %28 = vector.broadcast %cst_10 : f32 to vector<8x128xf32>
    %29 = arith.subf %28, %27 : vector<8x128xf32>
    %30 = arith.mulf %29, %29 : vector<8x128xf32>
    %31 = arith.mulf %30, %11 : vector<8x128xf32>
    %c0_11 = arith.constant 0 : index
    %32 = memref.load %arg1[%c0_11] : memref<2xf32, #tpu.memory_space<smem>>
    %c1 = arith.constant 1 : index
    %33 = memref.load %arg1[%c1] : memref<2xf32, #tpu.memory_space<smem>>
    %c0_12 = arith.constant 0 : index
    %34 = memref.load %arg1[%c0_12] : memref<2xf32, #tpu.memory_space<smem>>
    %35 = arith.subf %33, %34 : f32
    %36 = vector.broadcast %35 : f32 to vector<8x128xf32>
    %37 = arith.mulf %36, %1 : vector<8x128xf32>
    %38 = vector.broadcast %32 : f32 to vector<8x128xf32>
    %39 = arith.addf %38, %37 : vector<8x128xf32>
    %40 = arith.mulf %39, %31 : vector<8x128xf32>
    %41 = vector.shape_cast %40 : vector<8x128xf32> to vector<1x8x128xf32>
    %cst_13 = arith.constant dense<0.000000e+00> : vector<8x128xf32>
    %42 = vector.multi_reduction <add>, %41, %cst_13 [0] : vector<1x8x128xf32> to vector<8x128xf32>
    %c0_14 = arith.constant 0 : index
    %c0_15 = arith.constant 0 : index
    %43 = vector.load %arg4[%c0_14, %c0_15] : memref<8x128xf32, #tpu.memory_space<vmem>>, vector<8x128xf32>
    tpu.vector_store %arg4[%c0_14, %c0_15], %42 {strides = array<i32>} : memref<8x128xf32, #tpu.memory_space<vmem>>, vector<8x128xf32>,
    return
  }
  func.func @transform_0(%arg0: i32) -> i32 {
    %c0_i32 = arith.constant 0 : i32
    %c0_i32_0 = arith.constant 0 : i32
    return %c0_i32 : i32
  }
  func.func @transform_1(%arg0: i32) -> (i32, i32) {
    %c0_i32 = arith.constant 0 : i32
    %c0_i32_0 = arith.constant 0 : i32
    return %arg0, %c0_i32 : i32, i32
  }
  func.func @transform_2(%arg0: i32) -> (i32, i32) {
    %c0_i32 = arith.constant 0 : i32
    %c0_i32_0 = arith.constant 0 : i32
    return %arg0, %c0_i32 : i32, i32
  }
  func.func @transform_3(%arg0: i32) -> (i32, i32) {
    %c0_i32 = arith.constant 0 : i32
    %c0_i32_0 = arith.constant 0 : i32
    return %arg0, %c0_i32 : i32, i32
  }
}

</mosaic_0001>

<bundles_post_ra>
// kernel: tpu_custom_call.1
= control target key start
LH: loop header
LB: loop body
LE: loop exit
PB: predicated region body
PF: predicated region fallthrough
CT: control target
= control target key end

     0   :  { %s839_s0 = inlined_call_operand.hbm [shape: f32[2], index: 0, kind: input, shape index: {}]   ;;  %s840_s1 = inlined_call_operand.hbm [shape: f32[16,128], index: 1, kind: input, shape index: {}]   ;;  %s841_s2 = inlined_call_operand.hbm [shape: f32[16,128], index: 2, kind: input, shape index: {}]   ;;  %s842_s3 = inlined_call_operand.hbm [shape: f32[16,128], index: 3, kind: output, shape index: {}]  }
   0x1   :  { %843 = sst [smem:[#allocation14_spill]] %s839_s0 }
   0x2   :  { %8 = vsyncpa [#allocation5], 0 }
   0x3   :  { %9 = vsyncpa [#allocation3], 0 }
   0x4   :  { %11 = vsyncpa [#allocation3 + $0x1], 0 }
   0x5   :  { %12 = vsyncpa [#allocation8], 0 }
   0x6   :  { %14 = vsyncpa [#allocation8 + $0x1], 0 }
   0x7   :  { %15 = vsyncpa [#allocation4], 0 }
   0x8   :  { %17 = vsyncpa [#allocation4 + $0x1], 0  ;;  %s665_s12 = smov 0   ;;  %s667_s13 = smov 0  }
   0x9   :  { %s669_s14 = smov 0   ;;  %s671_s15 = smov 0  }
   0xa LB: > { %s686_s16 = sadd.s32 4294967295, %s641_s15   ;;  %s405_s17 = sadd.s32 4294967294, %s641_s15   ;;  %s641_s15 = sphi %s671_s15, %s854_s15   ;;  %s637_s14 = sphi %s669_s14, %s853_s14   ;;  %s633_s13 = sphi %s667_s13, %s852_s13   ;;  %s629_s12 = sphi %s665_s12, %s851_s12  }
   0xb   : > { %p64_p0 = scmp.ne.s32.totalorder %s633_s13, %s629_s12  ;;  %p65_p1 = scmp.eq.s32.totalorder %s686_s16, 0 }
   0xc   : > { %p114_p2 = scmp.eq.s32.totalorder %s686_s16, 1  ;;  %p120_p3 = scmp.eq.s32.totalorder %s405_s17, 1 }
   0xd   : > { %p695_p4 = por %p65_p1, %p64_p0  ;;  %p406_p5 = scmp.ge.s32.totalorder %s641_s15, 1 }
   0xe   : > { %p700_p6 = por %p120_p3, %p64_p0  ;;  %p127_p7 = scmp.lt.s32.totalorder %s641_s15, 3 }
   0xf   : > { %s846_s0 = sld [smem:[#allocation14_spill]]  ;;  %s716_s24 = sadd.s32 1, %s641_s15  }
  0x10   : > { %p708_p8 = pnand %p406_p5, %p127_p7  ;;  %s48_s25 = ssub.s32 %s641_s15, %s716_s24 }
  0x11   : > { %p49_p12 = scmp.eq.s32.totalorder %s48_s25, 0  ;;  %s51_s26 = sadd.s32 1, %s637_s14 }
  0x12   : > { %p433_p10 = pneg %p708_p8  ;;  %p58_p13 = scmp.ne.s32.totalorder %s637_s14, %s633_s13 }
  0x13   : > { %s643_s27 = smov [#allocation2]   ;;  %p59_p0 = scmp.eq.s32.totalorder %s641_s15, 0 }
  0x14   : > { %p434_p11 = pnand %p433_p10, %p65_p1  ;;  %p731_p3 = por %p114_p2, %p58_p13 }
  0x15   : > { %s139_s22 = sshll.u32 %s846_s0, 4  ;;  %p449_p5 = scmp.lt.s32.totalorder %s641_s15, 2  ;;  %s140_s22 = int_to_ptr.hbm [resolvable:$true] %s139_s22 }
  0x16   : > { %436 = dma.hbm_to_smem (!%p434_p11), %s140_s22, 16, %s643_s27, [#allocation5]  }
  0x17   : > { %s726_s28 = scalar_select %p49_p12, %s637_s14, %s51_s26  }
  0x18   : > { %s737_s30 = sand.u32 1, %s637_s14   ;;  %p60_p7 = por %p59_p0, %p58_p13 }
  0x19   : > { %s409_s4 = sshll.u32 %s737_s30, 3  ;;  %s410_s5 = sshll.u32 %s641_s15, 3 }
  0x1a   : > { %s158_s8 = scalar_lea.hbm %s840_s1, %s410_s5  ;;  %s154_s10 = scalar_lea.vmem [#allocation6], %s409_s4 }
  0x1b   : > { %s160_s9 = sshll.u32 %s158_s8, 4  ;;  %s162_s11 = sshll.u32 %s154_s10, 4  ;;  %s161_s9 = int_to_ptr.hbm [resolvable:$true] %s160_s9  ;;  %s163_s11 = int_to_ptr.vmem [resolvable:$true] %s162_s11 }
  0x1c   : > { %p744_p2 = pnand %p449_p5, %p60_p7  ;;  %s177_s22 = scalar_lea.hbm %s841_s2, %s410_s5 }
  0x1d   : > { %s179_s25 = sshll.u32 %s177_s22, 4  ;;  %s151_s26 = scalar_lea.sflag [#allocation3], %s737_s30  ;;  %s180_s25 = int_to_ptr.hbm [resolvable:$true] %s179_s25 }
  0x1e   : > { %s507_s27 = sshra.s32 %s161_s9, 4  ;;  %p511_p11 = pneg %p744_p2  ;;  %s508_s27 = int_to_ptr.hbm [resolvable:$true] %s507_s27 }
  0x1f   : > { %s509_s6 = scalar_lea.hbm %s508_s27, 8  ;;  %s514_s10 = scalar_lea.hbm %s840_s1, 16 }
  0x20   : > { %p510_p10 = scmp.ne.s32.totalorder %s508_s27, %s509_s6  ;;  %p515_p0 = scmp.lt.s32.totalorder %s508_s27, %s840_s1 }
  0x21   : > { %p516_p5 = scmp.lt.s32.totalorder %s514_s10, %s509_s6 }
  0x22   : > { %p512_p12 = pnand %p511_p11, %p510_p10 }
  0x23   : > { %p517_p7 = por %p516_p5, %p515_p0 }
  0x24   : > { %p513_p13 = pneg %p512_p12 }
  0x26   : > { %p518_p9 = pnand %p517_p7, %p513_p13 }
  0x28   : > { %521 = shalt.err (!%p518_p9)
}
  0x29   : > { %440 = dma.hbm_to_vmem [thread:$0]  (!%p744_p2), %s161_s9, 128, %s163_s11, %s151_s26  }
  0x2a   : > { %s173_s5 = scalar_lea.vmem [#allocation7], %s409_s4  ;;  %s170_s0 = scalar_lea.sflag [#allocation8], %s737_s30 }
  0x2b   : > { %s181_s22 = sshll.u32 %s173_s5, 4  ;;  %s537_s7 = sshra.s32 %s180_s25, 4  ;;  %s182_s22 = int_to_ptr.vmem [resolvable:$true] %s181_s22  ;;  %s538_s7 = int_to_ptr.hbm [resolvable:$true] %s537_s7 }
  0x2c   : > { %s539_s8 = scalar_lea.hbm %s538_s7, 8  ;;  %s544_s10 = scalar_lea.hbm %s841_s2, 16 }
  0x2d   : > { %p540_p10 = scmp.ne.s32.totalorder %s538_s7, %s539_s8  ;;  %p545_p9 = scmp.lt.s32.totalorder %s538_s7, %s841_s2 }
  0x2e   : > { %p546_p13 = scmp.lt.s32.totalorder %s544_s10, %s539_s8 }
  0x2f   : > { %p542_p12 = pnand %p540_p10, %p511_p11 }
  0x30   : > { %p547_p5 = por %p546_p13, %p545_p9 }
  0x31   : > { %p543_p0 = pneg %p542_p12 }
  0x33   : > { %p548_p7 = pnand %p547_p5, %p543_p0 }
  0x35   : > { %551 = shalt.err (!%p548_p7)
}
  0x36   : > { %443 = dma.hbm_to_vmem [thread:$0]  (!%p744_p2), %s180_s25, 128, %s182_s22, %s170_s0  }
  0x37   : > { %190 = sbr.rel (%p708_p8) target bundleno = 112 (0x70), region = 32 }
  0x3c   : > { %612 = dma.done.wait (%p65_p1), [#allocation5], 16  }
  0x3d   : > { %614 = vsyncadd (%p65_p1), [#allocation5], 4294967280  ;;  %s784_s30 = sand.u32 1, %s633_s13  }
  0x3e   : > { %s787_s4 = sshll.u32 %s784_s30, 3  ;;  %s198_s9 = scalar_lea.sflag [#allocation3], %s784_s30 }
  0x3f   : > { %s201_s0 = scalar_lea.vmem [#allocation6], %s787_s4 }
  0x40   : > { %616 = dma.done.wait (%p695_p4), %s198_s9, 128  }
  0x41   : > { %618 = vsyncadd (%p695_p4), %s198_s9, 4294967168  ;;  %s208_s23 = scalar_lea.sflag [#allocation8], %s784_s30  ;;  %s211_s11 = scalar_lea.vmem [#allocation7], %s787_s4 }
  0x42   : > { %620 = dma.done.wait (%p695_p4), %s208_s23, 128  }
  0x43   : > { %622 = vsyncadd (%p695_p4), %s208_s23, 4294967168 }
  0x44   : > { %217 = sfence }
  0x45   : > { %v241_v0 = vld [vmem:[%s201_s0] sm:$0xff]  ;;  %s801_s17 = sld [smem:[#allocation2]]  ;;  %v242_v6 = vld [vmem:[%s211_s11] sm:$0xff]  ;;  %vm644_vm3 = vmmov 1   ;;  %s420_s26 = sshll.u32 %s686_s16, 3 }
  0x46   : > { %v243_v1 = vand.u32 2147483647, %v241_v0  ;;  %s418_s25 = sld [smem:[#allocation2 + $0x1]]  ;;  %vm265_vm0 = vcmp.ge.f32.partialorder %v241_v0, 0.0  ;;  %vm266_vm1 = vcmp.gt.f32.partialorder %v242_v6, 0.5  ;;  %v247_v12 = vmax.f32 %v241_v0, 0.0  ;;  %s295_s7 = scalar_lea.hbm %s842_s3, %s420_s26 }
  0x47   : > { %vm267_vm2 = vmxor %vm265_vm0, %vm266_vm1  ;;  %v248_v13 = vmul.f32 %v242_v6, %v241_v0  ;;  %s240_s8 = scalar_lea.vmem [#allocation9], %s787_s4  ;;  %s299_s6 = sshll.u32 %s295_s7, 4  ;;  %s300_s6 = int_to_ptr.hbm [resolvable:$true] %s299_s6 }
  0x48   : > { %v244_v2 = vsub.f32 0.0, %v243_v1  ;;  %vm268_vm4 = vmxor %vm267_vm2, %vm644_vm3  ;;  %s297_s27 = sshll.u32 %s240_s8, 4  ;;  %s285_s16 = scalar_lea.sflag [#allocation4], %s784_s30  ;;  %s298_s27 = int_to_ptr.vmem [resolvable:$true] %s297_s27 }
  0x49   : > { %v249_v20 = vsub.f32 %v247_v12, %v248_v13  ;;  %s581_s10 = sshra.s32 %s300_s6, 4  ;;  %s587_s0 = scalar_lea.hbm %s842_s3, 16  ;;  %s582_s10 = int_to_ptr.hbm [resolvable:$true] %s581_s10 }
  0x4a   : > { %v245_v3 = vmul.f32 1.442695, %v244_v2  ;;  %s583_s20 = scalar_lea.hbm %s582_s10, 8  ;;  %p588_p2 = scmp.lt.s32.totalorder %s582_s10, %s842_s3 }
  0x4b   : > { %v279_v25 = vstv %s801_s17  ;;  %p584_p1 = scmp.ne.s32.totalorder %s582_s10, %s583_s20  ;;  %p589_p11 = scmp.lt.s32.totalorder %s587_s0, %s583_s20 }
  0x4c   : > { %486 = vpow2.f32 %v245_v3  ;;  %s276_s18 = ssub.f32 %s418_s25, %s801_s17 }
  0x4d   : > { %p585_p4 = pnand %p584_p1, %p731_p3  ;;  %p590_p10 = por %p589_p11, %p588_p2 }
  0x4e   : > { %v277_v19 = vstv %s276_s18 }
  0x4f   : > { %v278_v24 = vmul.f32 %v277_v19, %v242_v6  ;;  %p586_p8 = pneg %p585_p4 }
  0x51   : > { %v280_v29 = vadd.f32 %v279_v25, %v278_v24  ;;  %p591_p12 = pnand %p590_p10, %p586_p8 }
  0x52   : > { %v487_v4 = vpop.eup %486 }
  0x53   : > { %v250_v5 = vadd.f32 1.0, %v487_v4  ;;  %v253_v7 = vmul.f32 -0.5, %v487_v4  ;;  %v256_v10 = vand.u32 2147483647, %v487_v4  ;;  %v269_v18 = vsel %vm268_vm4, 1.0, %v487_v4 }
  0x55   : > { %488 = vlog2.f32 %v250_v5  ;;  %v254_v8 = vadd.f32 1.0, %v253_v7  ;;  %vm257_vm5 = vcmp.lt.f32.partialorder %v256_v10, 0.0004427343 }
  0x56   : > { %490 = vrcp.f32 %v250_v5 }
  0x57   : > { %v255_v16 = vmul.f32 %v487_v4, %v254_v8 }
  0x5b   : > { %v489_v9 = vpop.eup %488 }
  0x5c   : > { %v491_v11 = vpop.eup %490  ;;  %v252_v15 = vmul.f32 0.6931472, %v489_v9 }
  0x5d   : > { %v262_v14 = vmul.f32 %v491_v11, %v250_v5 }
  0x5e   : > { %v258_v22 = vsel %vm257_vm5, %v255_v16, %v252_v15 }
  0x5f   : > { %v263_v17 = vsub.f32 2.0, %v262_v14  ;;  %v259_v26 = vadd.f32 %v258_v22, %v249_v20 }
  0x61   : > { %v264_v21 = vmul.f32 %v491_v11, %v263_v17 }
  0x63   : > { %v270_v23 = vmul.f32 %v269_v18, %v264_v21 }
  0x65   : > { %v271_v27 = vsub.f32 1.0, %v270_v23 }
  0x67   : > { %v272_v28 = vmul.f32 %v271_v27, %v271_v27 }
  0x69   : > { %v273_v30 = vmul.f32 %v272_v28, %v259_v26 }
  0x6b   : > { %v281_v31 = vmul.f32 %v280_v29, %v273_v30 }
  0x6d   : > { %283 = vst [vmem:[%s240_s8] sm:$0xff] %v281_v31 }
  0x6e   : > { %594 = shalt.err (!%p591_p12)
}
  0x6f   : > { %431 = dma.vmem_to_hbm [thread:$0]  (%p731_p3), %s298_s27, 128, %s300_s6, %s285_s16  }
  0x70 PF: > { %s311_s30 = sand.u32 1, %s629_s12   ;;  %p850_p0 = scmp.ge.s32.totalorder %s641_s15, 2 }
  0x71   : > { %s312_s11 = scalar_lea.sflag [#allocation4], %s311_s30 }
  0x72   : > { %p445_p9 = pnand %p850_p0, %p700_p6 }
  0x74   : > { %p446_p13 = pneg %p445_p9 }
  0x76   : > { %624 = dma.done.wait (%p446_p13), %s312_s11, 128  }
  0x77   : > { %626 = vsyncadd (%p446_p13), %s312_s11, 4294967168  ;;  %p20_p5 = scmp.ge.s32.totalorder %s716_s24, 4   ;;  %s851_s12 = smov %s633_s13 }
  0x78   : > { %s852_s13 = smov %s637_s14  ;;  %s853_s14 = smov %s726_s28 }
  0x79   : > { %s854_s15 = smov %s716_s24  ;;  %22 = sbr.rel (!%p20_p5) target bundleno = 10 (0xa), region = 95 }
  0x7e   :  { %318 = vsyncpa [#allocation3], 1 }
  0x7f   :  { %320 = vsyncpa [#allocation3 + $0x1], 1 }
  0x80   :  { %321 = vsyncpa [#allocation8], 1 }
  0x81   :  { %323 = vsyncpa [#allocation8 + $0x1], 1 }
  0x82   :  { %324 = vsyncpa [#allocation4], 1 }
  0x83   :  { %326 = vsyncpa [#allocation4 + $0x1], 1 }
  0x84   :  { %327 = vsyncpa [#allocation5], 1 }
  0x85   :  { %329 = vsyncpa [#allocation5 + $0x1], 1 }

</bundles_post_ra>
